<compile_context>
chip_gen: v6e
topology: v6e:2x2x1
jax: 0.10.0
libtpu: 0.0.40
codegen_flags: <defaults>
</compile_context>

<pallas_src>
import functools

import jax
import jax.numpy as jnp
from jax.experimental import pallas as pl
from jax.experimental.pallas import tpu as pltpu

NEG_SLOPE = 0.01  # nn.LeakyReLU() default negative_slope

D_IN, D_H1, D_H2, D_OUT = 300, 256, 128, 32


def _leaky_relu(h):
    # Valid for 0 <= negative_slope <= 1: max(h, slope*h) == leaky_relu(h).
    return jnp.maximum(h, NEG_SLOPE * h)


def encoder_kernel(x_ref, w1_ref, b1_ref, w2_ref, b2_ref, w3_ref, b3_ref, o_ref):
    # Fused 3-layer MLP on one batch tile.
    # x arrives as raw f32 and is cast to the weights' dtype (bf16) on the VPU
    # here (cheap; this kernel is HBM-bound).  Matmuls accumulate in f32 on the
    # MXU; intermediate activations are handled in bf16, the final layer in f32.
    x = x_ref[...].astype(w1_ref.dtype)

    h = jnp.dot(x, w1_ref[...], preferred_element_type=jnp.float32) + b1_ref[...]
    h = _leaky_relu(h.astype(w2_ref.dtype))          # bf16 activation

    h = jnp.dot(h, w2_ref[...], preferred_element_type=jnp.float32) + b2_ref[...]
    h = _leaky_relu(h.astype(w3_ref.dtype))          # bf16 activation

    h = jnp.dot(h, w3_ref[...], preferred_element_type=jnp.float32) + b3_ref[...]
    o_ref[...] = _leaky_relu(h).astype(o_ref.dtype)  # final layer stays f32


def encoder_forward(x, params, block_b=1024, compute_dtype=jnp.bfloat16):
    """Fused 3-layer MLP forward.

    The grid tiles only the batch dimension; weights/biases are broadcast whole
    into VMEM (constant index_map -> DMA'd once and kept resident).  x is fed
    untouched (f32, K=300) and cast inside the kernel.  block_b is clamped so
    that (a) it is a multiple of 8 sublanes and (b) at least 2 grid steps remain
    when the batch allows it (keeps the x-tile DMA pipelined and both v7x
    TensorCores busy).
    """
    w1, b1, w2, b2, w3, b3 = params
    B = x.shape[0]

    # --- tile-size selection -------------------------------------------------
    bb = min(block_b, max(8, B // 2))   # keep >= 2 grid steps when possible
    bb = max(8, (bb // 8) * 8)          # sublane-aligned
    grid = (pl.cdiv(B, bb),)

    # --- one-time weight prep: cast tiny weights to bf16, biases stay f32 ----
    w1_c = w1.astype(compute_dtype)
    w2_c = w2.astype(compute_dtype)
    w3_c = w3.astype(compute_dtype)
    b1_f = b1.astype(jnp.float32)
    b2_f = b2.astype(jnp.float32)
    b3_f = b3.astype(jnp.float32)

    w_bytes = jnp.dtype(compute_dtype).itemsize
    flops = 2 * B * (D_IN * D_H1 + D_H1 * D_H2 + D_H2 * D_OUT)
    bytes_accessed = (B * D_IN * 4                                   # x (f32, unpadded)
                      + B * D_OUT * 4                                # output (f32)
                      + (D_IN * D_H1 + D_H1 * D_H2 + D_H2 * D_OUT) * w_bytes
                      + (D_H1 + D_H2 + D_OUT) * 4)                   # biases (f32)
    cost = pl.CostEstimate(flops=flops, transcendentals=0,
                           bytes_accessed=bytes_accessed)

    # NOTE: weight/bias specs could be single-buffered (pipeline_mode=pl.Buffered(1))
    # since their block index is constant; left at the default because the extra
    # buffer is <0.3 MB and irrelevant to VMEM headroom at these sizes.
    return pl.pallas_call(
        encoder_kernel,
        out_shape=jax.ShapeDtypeStruct((B, D_OUT), jnp.float32),
        grid=grid,
        in_specs=[
            pl.BlockSpec((bb, D_IN), lambda i: (i, 0)),     # x tile (batch-tiled, raw f32)
            pl.BlockSpec((D_IN, D_H1), lambda i: (0, 0)),   # W1 (full)
            pl.BlockSpec((1, D_H1), lambda i: (0, 0)),      # b1
            pl.BlockSpec((D_H1, D_H2), lambda i: (0, 0)),   # W2 (full)
            pl.BlockSpec((1, D_H2), lambda i: (0, 0)),      # b2
            pl.BlockSpec((D_H2, D_OUT), lambda i: (0, 0)),  # W3 (full)
            pl.BlockSpec((1, D_OUT), lambda i: (0, 0)),     # b3
        ],
        out_specs=pl.BlockSpec((bb, D_OUT), lambda i: (i, 0)),
        compiler_params=pltpu.CompilerParams(
            dimension_semantics=("parallel",)),
        cost_estimate=cost,
    )(x, w1_c, b1_f, w2_c, b2_f, w3_c, b3_f)


def init_params(key):
    """Deterministic init mirroring nn.Linear's default U(-1/sqrt(fan_in), 1/sqrt(fan_in)).
    Weights are stored as (in, out) for direct x @ W in the kernel."""
    def linear(k, fan_in, fan_out):
        kw, kb = jax.random.split(k)
        bound = 1.0 / jnp.sqrt(fan_in)
        w = jax.random.uniform(kw, (fan_in, fan_out), jnp.float32, -bound, bound)
        b = jax.random.uniform(kb, (1, fan_out), jnp.float32, -bound, bound)
        return w, b

    k1, k2, k3 = jax.random.split(key, 3)
    w1, b1 = linear(k1, D_IN, D_H1)
    w2, b2 = linear(k2, D_H1, D_H2)
    w3, b3 = linear(k3, D_H2, D_OUT)
    return (w1, b1, w2, b2, w3, b3)


def encoder_reference(x, params, compute_dtype=jnp.float32):
    """Pure-JAX reference.  With compute_dtype=bf16 it mirrors the kernel's
    precision exactly (bf16 operands + bf16 intermediate activations, f32
    accumulation, f32 final layer) for a tight check.  With f32 it is the
    PyTorch-equivalent forward."""
    w1, b1, w2, b2, w3, b3 = params
    h = jnp.dot(x.astype(compute_dtype), w1.astype(compute_dtype),
                preferred_element_type=jnp.float32) + b1
    h = _leaky_relu(h.astype(compute_dtype))
    h = jnp.dot(h, w2.astype(compute_dtype),
                preferred_element_type=jnp.float32) + b2
    h = _leaky_relu(h.astype(compute_dtype))
    h = jnp.dot(h, w3.astype(compute_dtype),
                preferred_element_type=jnp.float32) + b3
    return _leaky_relu(h)


if __name__ == "__main__":
    key = jax.random.PRNGKey(0)
    kx, kp = jax.random.split(key)

    B = 64  # small test batch; the bb clamp yields 2 grid steps of 32 rows
    x = jax.random.normal(kx, (B, D_IN), jnp.float32)
    params = init_params(kp)

    fwd = jax.jit(functools.partial(encoder_forward, block_b=1024,
                                    compute_dtype=jnp.bfloat16))
    out = jax.block_until_ready(fwd(x, params))

    assert out.shape == (B, D_OUT)
    # Tight check vs. a reference using the kernel's exact bf16 precision path.
    ref_bf16 = encoder_reference(x, params, compute_dtype=jnp.bfloat16)
    assert jnp.allclose(out, ref_bf16, atol=2e-3, rtol=2e-3), \
        "mismatch vs bf16-precision reference"
    # Loose check vs. the pure-f32 PyTorch-equivalent reference.
    ref_f32 = encoder_reference(x, params, compute_dtype=jnp.float32)
    assert jnp.allclose(out, ref_f32, atol=5e-2, rtol=5e-2), \
        "mismatch vs f32 reference"

    print("KERNEL_OK")
</pallas_src>

<mosaic_0001>
module attributes {stable_mosaic.version = 11 : i64} {
  func.func @encoder_kernel(%arg0: i32, %arg1: memref<32x300xf32, #tpu.memory_space<vmem>>, %arg2: memref<300x256xbf16, #tpu.memory_space<vmem>>, %arg3: memref<1x256xf32, #tpu.memory_space<vmem>>, %arg4: memref<256x128xbf16, #tpu.memory_space<vmem>>, %arg5: memref<1x128xf32, #tpu.memory_space<vmem>>, %arg6: memref<128x32xbf16, #tpu.memory_space<vmem>>, %arg7: memref<1x32xf32, #tpu.memory_space<vmem>>, %arg8: memref<32x32xf32, #tpu.memory_space<vmem>>) attributes {dimension_semantics = [#tpu.dimension_semantics<parallel>], iteration_bounds = array<i64: 2>, scalar_prefetch = 0 : i64, scratch_operands = 0 : i64, tpu.core_type = #tpu.core_type<tc>, window_params = [{transform_indices = @transform_0, window_bounds = array<i64: 32, 300>}, {pipeline_mode = #tpu.pipeline_mode<synchronous>, transform_indices = @transform_1, window_bounds = array<i64: 300, 256>}, {pipeline_mode = #tpu.pipeline_mode<synchronous>, transform_indices = @transform_2, window_bounds = array<i64: 1, 256>}, {pipeline_mode = #tpu.pipeline_mode<synchronous>, transform_indices = @transform_3, window_bounds = array<i64: 256, 128>}, {pipeline_mode = #tpu.pipeline_mode<synchronous>, transform_indices = @transform_4, window_bounds = array<i64: 1, 128>}, {pipeline_mode = #tpu.pipeline_mode<synchronous>, transform_indices = @transform_5, window_bounds = array<i64: 128, 32>}, {pipeline_mode = #tpu.pipeline_mode<synchronous>, transform_indices = @transform_6, window_bounds = array<i64: 1, 32>}, {transform_indices = @transform_7, window_bounds = array<i64: 32, 32>}]} {
    %c0 = arith.constant 0 : index
    %c0_0 = arith.constant 0 : index
    %0 = vector.load %arg1[%c0, %c0_0] : memref<32x300xf32, #tpu.memory_space<vmem>>, vector<32x300xf32>
    %1 = arith.truncf %0 : vector<32x300xf32> to vector<32x300xbf16>
    %c0_1 = arith.constant 0 : index
    %c0_2 = arith.constant 0 : index
    %2 = vector.load %arg2[%c0_1, %c0_2] : memref<300x256xbf16, #tpu.memory_space<vmem>>, vector<300x256xbf16>
    %cst = arith.constant dense<0.000000e+00> : vector<32x256xf32>
    %3 = tpu.matmul %1, %2, %cst {dimension_numbers = #tpu.dot_dimension_numbers<[1], [0], [0], [1], [0, 0, 1, 1], [], []>} : vector<32x300xbf16>, vector<300x256xbf16>, vector<32x256xf32> -> vector<32x256xf32>
    %c0_3 = arith.constant 0 : index
    %c0_4 = arith.constant 0 : index
    %4 = vector.load %arg3[%c0_3, %c0_4] : memref<1x256xf32, #tpu.memory_space<vmem>>, vector<1x256xf32>
    %5 = vector.broadcast %4 : vector<1x256xf32> to vector<32x256xf32>
    %6 = arith.addf %3, %5 : vector<32x256xf32>
    %7 = arith.truncf %6 : vector<32x256xf32> to vector<32x256xbf16>
    %cst_5 = arith.constant 1.000980e-02 : bf16
    %8 = vector.broadcast %cst_5 : bf16 to vector<32x256xbf16>
    %9 = arith.mulf %8, %7 : vector<32x256xbf16>
    %10 = arith.maximumf %7, %9 : vector<32x256xbf16>
    %c0_6 = arith.constant 0 : index
    %c0_7 = arith.constant 0 : index
    %11 = vector.load %arg4[%c0_6, %c0_7] : memref<256x128xbf16, #tpu.memory_space<vmem>>, vector<256x128xbf16>
    %cst_8 = arith.constant dense<0.000000e+00> : vector<32x128xf32>
    %12 = tpu.matmul %10, %11, %cst_8 {dimension_numbers = #tpu.dot_dimension_numbers<[1], [0], [0], [1], [0, 0, 1, 1], [], []>} : vector<32x256xbf16>, vector<256x128xbf16>, vector<32x128xf32> -> vector<32x128xf32>
    %c0_9 = arith.constant 0 : index
    %c0_10 = arith.constant 0 : index
    %13 = vector.load %arg5[%c0_9, %c0_10] : memref<1x128xf32, #tpu.memory_space<vmem>>, vector<1x128xf32>
    %14 = vector.broadcast %13 : vector<1x128xf32> to vector<32x128xf32>
    %15 = arith.addf %12, %14 : vector<32x128xf32>
    %16 = arith.truncf %15 : vector<32x128xf32> to vector<32x128xbf16>
    %cst_11 = arith.constant 1.000980e-02 : bf16
    %17 = vector.broadcast %cst_11 : bf16 to vector<32x128xbf16>
    %18 = arith.mulf %17, %16 : vector<32x128xbf16>
    %19 = arith.maximumf %16, %18 : vector<32x128xbf16>
    %c0_12 = arith.constant 0 : index
    %c0_13 = arith.constant 0 : index
    %20 = vector.load %arg6[%c0_12, %c0_13] : memref<128x32xbf16, #tpu.memory_space<vmem>>, vector<128x32xbf16>
    %cst_14 = arith.constant dense<0.000000e+00> : vector<32x32xf32>
    %21 = tpu.matmul %19, %20, %cst_14 {dimension_numbers = #tpu.dot_dimension_numbers<[1], [0], [0], [1], [0, 0, 1, 1], [], []>} : vector<32x128xbf16>, vector<128x32xbf16>, vector<32x32xf32> -> vector<32x32xf32>
    %c0_15 = arith.constant 0 : index
    %c0_16 = arith.constant 0 : index
    %22 = vector.load %arg7[%c0_15, %c0_16] : memref<1x32xf32, #tpu.memory_space<vmem>>, vector<1x32xf32>
    %23 = vector.broadcast %22 : vector<1x32xf32> to vector<32x32xf32>
    %24 = arith.addf %21, %23 : vector<32x32xf32>
    %cst_17 = arith.constant 0.00999999977 : f32
    %25 = vector.broadcast %cst_17 : f32 to vector<32x32xf32>
    %26 = arith.mulf %25, %24 : vector<32x32xf32>
    %27 = arith.maximumf %24, %26 : vector<32x32xf32>
    %c0_18 = arith.constant 0 : index
    %c0_19 = arith.constant 0 : index
    %28 = vector.load %arg8[%c0_18, %c0_19] : memref<32x32xf32, #tpu.memory_space<vmem>>, vector<32x32xf32>
    tpu.vector_store %arg8[%c0_18, %c0_19], %27 {strides = array<i32>} : memref<32x32xf32, #tpu.memory_space<vmem>>, vector<32x32xf32>,
    return
  }
  func.func @transform_0(%arg0: i32) -> (i32, i32) {
    %c0_i32 = arith.constant 0 : i32
    %c0_i32_0 = arith.constant 0 : i32
    return %arg0, %c0_i32 : i32, i32
  }
  func.func @transform_1(%arg0: i32) -> (i32, i32) {
    %c0_i32 = arith.constant 0 : i32
    %c0_i32_0 = arith.constant 0 : i32
    %c0_i32_1 = arith.constant 0 : i32
    return %c0_i32, %c0_i32_0 : i32, i32
  }
  func.func @transform_2(%arg0: i32) -> (i32, i32) {
    %c0_i32 = arith.constant 0 : i32
    %c0_i32_0 = arith.constant 0 : i32
    %c0_i32_1 = arith.constant 0 : i32
    return %c0_i32, %c0_i32_0 : i32, i32
  }
  func.func @transform_3(%arg0: i32) -> (i32, i32) {
    %c0_i32 = arith.constant 0 : i32
    %c0_i32_0 = arith.constant 0 : i32
    %c0_i32_1 = arith.constant 0 : i32
    return %c0_i32, %c0_i32_0 : i32, i32
  }
  func.func @transform_4(%arg0: i32) -> (i32, i32) {
    %c0_i32 = arith.constant 0 : i32
    %c0_i32_0 = arith.constant 0 : i32
    %c0_i32_1 = arith.constant 0 : i32
    return %c0_i32, %c0_i32_0 : i32, i32
  }
  func.func @transform_5(%arg0: i32) -> (i32, i32) {
    %c0_i32 = arith.constant 0 : i32
    %c0_i32_0 = arith.constant 0 : i32
    %c0_i32_1 = arith.constant 0 : i32
    return %c0_i32, %c0_i32_0 : i32, i32
  }
  func.func @transform_6(%arg0: i32) -> (i32, i32) {
    %c0_i32 = arith.constant 0 : i32
    %c0_i32_0 = arith.constant 0 : i32
    %c0_i32_1 = arith.constant 0 : i32
    return %c0_i32, %c0_i32_0 : i32, i32
  }
  func.func @transform_7(%arg0: i32) -> (i32, i32) {
    %c0_i32 = arith.constant 0 : i32
    %c0_i32_0 = arith.constant 0 : i32
    return %arg0, %c0_i32 : i32, i32
  }
}

</mosaic_0001>

<bundles_post_ra>
// kernel: encoder_forward.1
= control target key start
LH: loop header
LB: loop body
LE: loop exit
PB: predicated region body
PF: predicated region fallthrough
CT: control target
= control target key end

     0   :  { %s1330_s24 = smov 0   ;;  %s1564_s0 = inlined_call_operand.vmem [shape: f32[64,300], index: 0, kind: input, shape index: {}]   ;;  %s1565_s1 = inlined_call_operand.vmem [shape: bf16[300,256], index: 1, kind: input, shape index: {}]   ;;  %s1566_s2 = inlined_call_operand.vmem [shape: f32[1,256], index: 2, kind: input, shape index: {}]   ;;  %s1567_s3 = inlined_call_operand.vmem [shape: bf16[256,128], index: 3, kind: input, shape index: {}]   ;;  %s1568_s4 = inlined_call_operand.vmem [shape: f32[1,128], index: 4, kind: input, shape index: {}]   ;;  %s1569_s5 = inlined_call_operand.vmem [shape: bf16[128,32], index: 5, kind: input, shape index: {}]   ;;  %s1570_s6 = inlined_call_operand.vmem [shape: f32[1,32], index: 6, kind: input, shape index: {}]   ;;  %s1571_s7 = inlined_call_operand.vmem [shape: f32[64,32], index: 7, kind: output, shape index: {}]  }
   0x1 LB: > { %s1054_s25 = sadd.s32 4294967295, %s1287_s24   ;;  %p1058_p0 = scmp.ge.s32.totalorder %s1287_s24, 1  ;;  %s1287_s24 = sphi %s1330_s24, %s17_s24  }
   0x2   : > { %p239_p1 = scmp.lt.s32.totalorder %s1287_s24, 3 }
   0x4   : > { %p240_p2 = pnand %p1058_p0, %p239_p1 }
   0x5   : > { %s1059_s15 = sshll.u32 (!%p240_p2), %s1054_s25, 2 }
   0x6   : > { %243 = sbr.rel (%p240_p2) target bundleno = 709 (0x2c5), region = 48  ;;  %p273_p3 = scmp.lt.s32.totalorder (!%p240_p2), %s1059_s15, 7 }
   0xb   : > { %v1200_v0 = vld [vmem:[%s1565_s1 + $0x74] ss:$8 sps:$4 sm:$0xff]   ;;  %v1202_v1 = vld [vmem:[%s1565_s1 + $0x70] ss:$8 sps:$4 sm:$0xff]   ;;  %v1289_v2 = vmov 0   ;;  %s1573_s15 = smov (!%p273_p3, %s1059_s15), 7 }
   0xc   : > { %642 = vmatprep.mubr.bf16.mxu1 %v1289_v2  ;;  %557 = vmatprep.subr.bf16.mxu0 %v1200_v0  ;;  %v1203_v3 = vld [vmem:[%s1565_s1 + $0x64] ss:$8 sps:$4 sm:$0xff]   ;;  %v1205_v4 = vld [vmem:[%s1565_s1 + $0x60] ss:$8 sps:$4 sm:$0xff]   ;;  %v1206_v5 = vld [vmem:[%s1565_s1 + $0x54] ss:$8 sps:$4 sm:$0xff]  }
   0xd   : > { %558 = vmatpush1.bf16.msra.mxu0 %v1202_v1  ;;  %v1208_v6 = vld [vmem:[%s1565_s1 + $0x50] ss:$8 sps:$4 sm:$0xff]   ;;  %v1209_v7 = vld [vmem:[%s1565_s1 + $0x44] ss:$8 sps:$4 sm:$0xff]   ;;  %v1211_v8 = vld [vmem:[%s1565_s1 + $0x40] ss:$8 sps:$4 sm:$0xff]  }
   0xe   : > { %559 = vmatprep.subr.bf16.mxu0 %v1203_v3  ;;  %v1212_v9 = vld [vmem:[%s1565_s1 + $0x34] ss:$8 sps:$4 sm:$0xff]   ;;  %v1214_v10 = vld [vmem:[%s1565_s1 + $0x30] ss:$8 sps:$4 sm:$0xff]   ;;  %v1215_v11 = vld [vmem:[%s1565_s1 + $0x24] ss:$8 sps:$4 sm:$0xff]  }
   0xf   : > { %vm550_vm0 = vcmask 1045504   ;;  %v1238_v12 = vld [vmem:[%s1565_s1 + $0x124] ss:$8 sps:$4 sm:$0x3f]   ;;  %s1190_s8 = smul.u32 24, %s1573_s15  ;;  %vm543_vm1 = vcmask 359424  }
  0x10   : > { %v1241_v13 = vld [vmem:[%s1565_s1 + $0x120] ss:$8 sps:$4 sm:$0x3f]   ;;  %1101 = vmatprep.subr.msk.bf16.mxu1 %vm550_vm0, %v1238_v12  ;;  %v1218_v15 = vld [vmem:[%s1565_s1 + $0x14] ss:$8 sps:$4 sm:$0xff]   ;;  %s1062_s13 = sshll.u32 %s1573_s15, 3 }
  0x11   : > { %560 = vmatpush1.bf16.msra.mxu0 %v1205_v4  ;;  %v1217_v14 = vld [vmem:[%s1565_s1 + $0x20] ss:$8 sps:$4 sm:$0xff]   ;;  %v552_v16 = vsel %vm550_vm0, %v1241_v13, 0  ;;  %v1244_v17 = vld [vmem:[%s1565_s1 + $0x114] ss:$8 sps:$4 sm:$0xff]   ;;  %s1396_s20 = scalar_lea.vmem %s1564_s0, %s1190_s8  ;;  %s283_s17 = scalar_lea.vmem %s1571_s7, %s1062_s13  ;;  %vm993_vm2 = vcmask 261120  }
  0x12   : > { %561 = vmatprep.subr.bf16.mxu0 %v1206_v5  ;;  %621 = vmatpush1.bf16.msra.mxu1 %v552_v16  ;;  %v1247_v18 = vld [vmem:[%s1565_s1 + $0x110] ss:$8 sps:$4 sm:$0xff]   ;;  %v1250_v20 = vld [vmem:[%s1565_s1 + $0x104] ss:$8 sps:$4 sm:$0xff]   ;;  %v1253_v22 = vld [vmem:[%s1565_s1 + $0x100] ss:$8 sps:$4 sm:$0xff]  }
  0x13   : > { %622 = vmatprep.subr.bf16.mxu1 %v1244_v17  ;;  %v1220_v19 = vld [vmem:[%s1565_s1 + $0x10] ss:$8 sps:$4 sm:$0xff]   ;;  %v1221_v21 = vld [vmem:[%s1565_s1 + $0x4] ss:$8 sps:$4 sm:$0xff]   ;;  %v1223_v27 = vld [vmem:[%s1565_s1] ss:$8 sps:$4 sm:$0xff]  }
  0x14   : > { %v289_v23 = vld [vmem:[%s1396_s20 + $0x10] sm:$0xff]  ;;  %v292_v24 = vld [vmem:[%s1396_s20 + $0x28] sm:$0xff]  ;;  %v291_v26 = vld [vmem:[%s1396_s20 + $0x20] sm:$0xff] }
  0x15   : > { %562 = vmatpush1.bf16.msra.mxu0 %v1208_v6  ;;  %v288_v25 = vld [vmem:[%s1396_s20 + $0x8] sm:$0xff]  ;;  %v1224_v29 = vld [vmem:[%s1565_s1 + $0xf4] ss:$8 sps:$4 sm:$0xff]   ;;  %v301_v30 = vpack.c.bf16 %v292_v24, %v289_v23  ;;  %v1226_v31 = vld [vmem:[%s1565_s1 + $0xf0] ss:$8 sps:$4 sm:$0xff]  }
  0x16   : > { %563 = vmatprep.subr.bf16.mxu0 %v1209_v7  ;;  %623 = vmatpush1.bf16.msra.mxu1 %v1247_v18  ;;  %v300_v28 = vpack.c.bf16 %v291_v26, %v288_v25  ;;  %v1227_v32 = vld [vmem:[%s1565_s1 + $0xe4] ss:$8 sps:$4 sm:$0xff]   ;;  %v1257_v33 = vld [vmem:[%s1567_s3 + $0x78] sm:$0xff]   ;;  %v1259_v36 = vld [vmem:[%s1567_s3 + $0x70] sm:$0xff]  }
  0x17   : > { %624 = vmatprep.subr.bf16.mxu1 %v1250_v20  ;;  %v295_v34 = vld [vmem:[%s1396_s20 + $0x40] sm:$0xff]  ;;  %v1258_v35 = vld [vmem:[%s1567_s3 + $0x38] sm:$0xff]   ;;  %v1260_v40 = vld [vmem:[%s1567_s3 + $0x30] sm:$0xff]  }
  0x18   : > { %589 = vmatprep.mubr.bf16.mxu0 %v300_v28  ;;  %v1229_v37 = vld [vmem:[%s1565_s1 + $0xe0] ss:$8 sps:$4 sm:$0xff]   ;;  %v298_v38 = vld [vmem:[%s1396_s20 + $0x58] sm:$0xff]  ;;  %v1233_v45 = vld [vmem:[%s1565_s1 + $0xc4] ss:$8 sps:$4 sm:$0xff]  }
  0x19   : > { %564 = vmatpush1.bf16.msra.mxu0 %v1211_v8  ;;  %v1230_v39 = vld [vmem:[%s1565_s1 + $0xd4] ss:$8 sps:$4 sm:$0xff]   ;;  %v1261_v41 = vld [vmem:[%s1567_s3 + $0x68] sm:$0xff]   ;;  %v304_v42 = vpack.c.bf16 %v298_v38, %v295_v34  ;;  %v1232_v44 = vld [vmem:[%s1565_s1 + $0xd0] ss:$8 sps:$4 sm:$0xff]  }
  0x1a   : > { %565 = vmatprep.subr.bf16.mxu0 %v1212_v9  ;;  %625 = vmatpush1.bf16.msra.mxu1 %v1253_v22  ;;  %v1262_v43 = vld [vmem:[%s1567_s3 + $0x28] sm:$0xff]   ;;  %v1236_v47 = vld [vmem:[%s1565_s1 + $0xb4] ss:$8 sps:$4 sm:$0xff]   ;;  %v1240_v48 = vld [vmem:[%s1565_s1 + $0xb0] ss:$8 sps:$4 sm:$0xff]  }
  0x1b   : > { %1132 = vmatprep.subr.bf16.mxu1 %v1257_v33  ;;  %v1235_v46 = vld [vmem:[%s1565_s1 + $0xc0] ss:$8 sps:$4 sm:$0xff]   ;;  %v1242_v49 = vld [vmem:[%s1565_s1 + $0xa4] ss:$8 sps:$4 sm:$0xff]   ;;  %v1248_v51 = vld [vmem:[%s1565_s1 + $0x94] ss:$8 sps:$4 sm:$0xff]  }
  0x1c   : > { %v1246_v50 = vld [vmem:[%s1565_s1 + $0xa0] ss:$8 sps:$4 sm:$0xff]   ;;  %v1252_v52 = vld [vmem:[%s1565_s1 + $0x90] ss:$8 sps:$4 sm:$0xff]   ;;  %v1254_v53 = vld [vmem:[%s1565_s1 + $0x84] ss:$8 sps:$4 sm:$0xff]  }
  0x1d   : > { %566 = vmatpush1.bf16.msra.mxu0 %v1214_v10  ;;  %1102 = vmatmul.mubr.msk.bf16.vlgmr.msra.gmra.mxu1 %vm543_vm1, %v301_v30  ;;  %v1256_v54 = vld [vmem:[%s1565_s1 + $0x80] ss:$8 sps:$4 sm:$0xff]   ;;  %v290_v56 = vld [vmem:[%s1396_s20 + $0x18] sm:$0xff]  ;;  %v297_v58 = vld [vmem:[%s1396_s20 + $0x50] sm:$0xff] }
  0x1e   : > { %567 = vmatprep.subr.bf16.mxu0 %v1215_v11  ;;  %652 = vmatprep.mubr.bf16.mxu1 %v1289_v2  ;;  %v287_v55 = vld [vmem:[%s1396_s20] sm:$0xff]  ;;  %v294_v57 = vld [vmem:[%s1396_s20 + $0x38] sm:$0xff]  ;;  %v293_v61 = vld [vmem:[%s1396_s20 + $0x30] sm:$0xff]  ;;  %v345_v11 = vlaneseq }
  0x1f   : > { %1133 = vmatpush3.bf16.msra.mxu1 %v1258_v35  ;;  %v299_v59 = vpack.c.bf16 %v290_v56, %v287_v55  ;;  %v303_v60 = vpack.c.bf16 %v297_v58, %v294_v57  ;;  %v296_v62 = vld [vmem:[%s1396_s20 + $0x48] sm:$0xff]  ;;  %v1263_v0 = vld [vmem:[%s1567_s3 + $0x60] sm:$0xff]   ;;  %v1265_v2 = vld [vmem:[%s1567_s3 + $0x58] sm:$0xff]  }
  0x20   : > { %1134 = vmatprep.subr.bf16.mxu1 %v1259_v36  ;;  %v302_v63 = vpack.c.bf16 %v296_v62, %v293_v61  ;;  %v1264_v1 = vld [vmem:[%s1567_s3 + $0x20] sm:$0xff]   ;;  %v1266_v3 = vld [vmem:[%s1567_s3 + $0x18] sm:$0xff]   ;;  %v1267_v4 = vld [vmem:[%s1567_s3 + $0x50] sm:$0xff]   ;;  %v346_v13 = vshrl.u32 %v345_v11, 7 }
  0x21   : > { %568 = vmatpush1.bf16.msra.mxu0 %v1217_v14  ;;  %v1268_v5 = vld [vmem:[%s1567_s3 + $0x10] sm:$0xff]   ;;  %v1269_v6 = vld [vmem:[%s1567_s3 + $0x48] sm:$0xff]   ;;  %v1271_v8 = vld [vmem:[%s1567_s3 + $0x40] sm:$0xff]  }
  0x22   : > { %569 = vmatprep.subr.bf16.mxu0 %v1218_v15  ;;  %v1270_v7 = vld [vmem:[%s1567_s3 + $0x8] sm:$0xff]   ;;  %v1272_v9 = vld [vmem:[%s1567_s3] sm:$0xff]   ;;  %v1273_v10 = vld [vmem:[%s1569_s5 + $0x38] sm:$0xff]   ;;  %v347_v15 = vsub.s32 0, %v346_v13  ;;  %v351_v18 = vsub.s32 1, %v346_v13 }
  0x23   : > { %1135 = vmatpush3.bf16.msra.mxu1 %v1260_v40  ;;  %v343_v16 = vld [vmem:[%s1566_s2] sm:$0x3] }
  0x24   : > { %1136 = vmatprep.subr.bf16.mxu1 %v1261_v41  ;;  %v352_v22 = vrot.slane %v343_v16, %v351_v18 }
  0x25   : > { %570 = vmatpush1.bf16.msra.mxu0 %v1220_v19  ;;  %1103 = vmatmul.mubr.msk.bf16.gmra.mxu1 %vm543_vm1, %v304_v42  ;;  %v348_v19 = vrot.slane %v343_v16, %v347_v15 }
  0x26   : > { %571 = vmatprep.subr.bf16.mxu0 %v1221_v21 }
  0x27   : > { %1137 = vmatpush3.bf16.msra.mxu1 %v1262_v43 }
  0x28   : > { %1138 = vmatprep.subr.bf16.mxu1 %v1263_v0  ;;  %v1276_v0 = vld [vmem:[%s1569_s5 + $0x20] sm:$0xff]  }
  0x29   : > { %572 = vmatpush1.bf16.msra.mxu0 %v1223_v27 }
  0x2a   : > { %573 = vmatprep.subr.bf16.mxu0 %v1224_v29 }
  0x2b   : > { %1139 = vmatpush3.bf16.msra.mxu1 %v1264_v1  ;;  %v1277_v1 = vld [vmem:[%s1569_s5 + $0x18] sm:$0xff]  }
  0x2c   : > { %1140 = vmatprep.subr.bf16.mxu1 %v1265_v2  ;;  %v1278_v2 = vld [vmem:[%s1569_s5 + $0x10] sm:$0xff]  }
  0x2d   : > { %574 = vmatpush2.bf16.msra.mxu0 %v1226_v31 }
  0x2e   : > { %575 = vmatprep.subr.bf16.mxu0 %v1227_v32 }
  0x2f   : > { %1141 = vmatpush3.bf16.msra.mxu1 %v1266_v3  ;;  %v1279_v3 = vld [vmem:[%s1569_s5 + $0x8] sm:$0xff]  }
  0x30   : > { %1142 = vmatprep.subr.bf16.mxu1 %v1267_v4  ;;  %v1280_v4 = vld [vmem:[%s1569_s5] sm:$0xff]  }
  0x31   : > { %576 = vmatpush2.bf16.msra.mxu0 %v1229_v37 }
  0x32   : > { %577 = vmatprep.subr.bf16.mxu0 %v1230_v39 }
  0x33   : > { %1143 = vmatpush3.bf16.msra.mxu1 %v1268_v5 }
  0x34   : > { %1144 = vmatprep.subr.bf16.mxu1 %v1269_v6 }
  0x35   : > { %578 = vmatpush2.bf16.msra.mxu0 %v1232_v44 }
  0x36   : > { %579 = vmatprep.subr.bf16.mxu0 %v1233_v45 }
  0x37   : > { %1145 = vmatpush3.bf16.msra.mxu1 %v1270_v7 }
  0x38   : > { %1146 = vmatprep.subr.bf16.mxu1 %v1271_v8 }
  0x39   : > { %580 = vmatpush2.bf16.msra.mxu0 %v1235_v46 }
  0x3a   : > { %581 = vmatprep.subr.bf16.mxu0 %v1236_v47 }
  0x3b   : > { %1147 = vmatpush3.bf16.msra.mxu1 %v1272_v9  ;;  %v1104_v9 = vld [vmem:[%s1568_s4] ss:$0 sm:$0xff] }
  0x3c   : > { %1170 = vmatprep.subr.bf16.mxu1 %v1273_v10 }
  0x3d   : > { %582 = vmatpush2.bf16.msra.mxu0 %v1240_v48 }
  0x3e   : > { %583 = vmatprep.subr.bf16.mxu0 %v1242_v49 }
  0x41   : > { %584 = vmatpush2.bf16.msra.mxu0 %v1246_v50 }
  0x42   : > { %585 = vmatprep.subr.bf16.mxu0 %v1248_v51 }
  0x45   : > { %586 = vmatpush2.bf16.msra.mxu0 %v1252_v52 }
  0x46   : > { %587 = vmatprep.subr.bf16.mxu0 %v1254_v53 }
  0x49   : > { %588 = vmatpush2.bf16.msra.mxu0 %v1256_v54  ;;  %v1274_v54 = vld [vmem:[%s1569_s5 + $0x30] sm:$0xff]  }
  0x4c   : > { %590 = vmatmul.mubr.bf16.vlgmr.msra.gmra.mxu0 %v299_v59 }
  0x4d   : > { %599 = vmatprep.mubr.bf16.mxu0 %v303_v60 }
  0x54   : > { %600 = vmatmul.mubr.bf16.gmra.mxu0 %v302_v63  ;;  %v1275_v63 = vld [vmem:[%s1569_s5 + $0x28] sm:$0xff]  }
  0xdd   : > { %v644_v12 = vpop.f32.mrf.mxu1 }
  0xdf   : > { %v646_v14 = vpop.f32.mrf.mxu1 }
  0xe1   : > { %v648_v17 = vpop.f32.mrf.mxu1 }
  0xe3   : > { %v650_v21 = vpop.f32.mrf.mxu1 }
  0xe5   : > { %v654_v26 = vpop.f32.mrf.mxu1 }
  0xe7   : > { %v656_v33 = vpop.f32.mrf.mxu1 }
  0xe9   : > { %v658_v42 = vpop.f32.mrf.mxu1 }
  0xeb   : > { %v660_v53 = vpop.f32.mrf.mxu1 }
 0x10c   : > { %v591_v20 = vpop.f32.mrf.mxu0 }
 0x10d   : > { %v592_v24 = vadd.f32 %v591_v20, %v348_v19 }
 0x10e   : > { %v593_v23 = vpop.f32.mrf.mxu0 }
 0x10f   : > { %v594_v27 = vadd.f32 %v593_v23, %v352_v22  ;;  %v645_v30 = vadd.f32 %v644_v12, %v592_v24 }
 0x110   : > { %v595_v25 = vpop.f32.mrf.mxu0 }
 0x111   : > { %v596_v28 = vadd.f32 %v595_v25, %v348_v19  ;;  %v647_v35 = vadd.f32 %v646_v14, %v594_v27 }
 0x112   : > { %v597_v29 = vpop.f32.mrf.mxu0 }
 0x113   : > { %v649_v31 = vadd.f32 %v648_v17, %v596_v28  ;;  %v598_v32 = vadd.f32 %v597_v29, %v352_v22  ;;  %v1121_v29 = vld [vmem:[%s1570_s6] ss:$0 sm:$0xff] }
 0x114   : > { %v601_v34 = vpop.f32.mrf.mxu0 }
 0x115   : > { %v663_v36 = vpack.c.bf16 %v649_v31, %v645_v30  ;;  %v651_v37 = vadd.f32 %v650_v21, %v598_v32  ;;  %v602_v40 = vadd.f32 %v601_v34, %v348_v19 }
 0x116   : > { %v603_v38 = vpop.f32.mrf.mxu0 }
 0x117   : > { %v664_v39 = vpack.c.bf16 %v651_v37, %v647_v35  ;;  %v667_v41 = vmul.bf16 1009007652, %v663_v36  ;;  %v604_v44 = vadd.f32 %v603_v38, %v352_v22  ;;  %v655_v48 = vadd.f32 %v654_v26, %v602_v40 }
 0x118   : > { %v605_v43 = vpop.f32.mrf.mxu0 }
 0x119   : > { %v606_v45 = vadd.f32 %v605_v43, %v348_v19  ;;  %v668_v46 = vmul.bf16 1009007652, %v664_v39  ;;  %v671_v52 = vmax.bf16 %v667_v41, %v663_v36  ;;  %v657_v55 = vadd.f32 %v656_v33, %v604_v44 }
 0x11a   : > { %v607_v47 = vpop.f32.mrf.mxu0 }
 0x11b   : > { %v659_v49 = vadd.f32 %v658_v42, %v606_v45  ;;  %v608_v50 = vadd.f32 %v607_v47, %v352_v22  ;;  %v672_v51 = vmax.bf16 %v668_v46, %v664_v39 }
 0x11d   : > { %v665_v56 = vpack.c.bf16 %v659_v49, %v655_v48  ;;  %v661_v57 = vadd.f32 %v660_v53, %v608_v50  ;;  %842 = vmatprep.mubr.bf16.mxu1 %v672_v51 }
 0x11e   : > { %843 = vmatmul.mubr.bf16.vlgmr.msra.gmra.mxu1 %v671_v52 }
 0x11f   : > { %v666_v58 = vpack.c.bf16 %v661_v57, %v657_v55  ;;  %1171 = vmatpush3.bf16.msra.mxu1 %v1273_v10  ;;  %v669_v59 = vmul.bf16 1009007652, %v665_v56 }
 0x120   : > { %1172 = vmatprep.subr.bf16.mxu1 %v1274_v54 }
 0x121   : > { %v670_v60 = vmul.bf16 1009007652, %v666_v58  ;;  %v673_v62 = vmax.bf16 %v669_v59, %v665_v56 }
 0x123   : > { %v674_v61 = vmax.bf16 %v670_v60, %v666_v58  ;;  %1173 = vmatpush3.bf16.msra.mxu1 %v1274_v54 }
 0x124   : > { %1174 = vmatprep.subr.bf16.mxu1 %v1275_v63 }
 0x125   : > { %850 = vmatprep.mubr.bf16.mxu1 %v674_v61 }
 0x126   : > { %851 = vmatmul.mubr.bf16.gmra.mxu1 %v673_v62 }
 0x127   : > { %1175 = vmatpush3.bf16.msra.mxu1 %v1275_v63 }
 0x128   : > { %1176 = vmatprep.subr.bf16.mxu1 %v1276_v0 }
 0x12b   : > { %1177 = vmatpush3.bf16.msra.mxu1 %v1276_v0 }
 0x12c   : > { %1178 = vmatprep.subr.bf16.mxu1 %v1277_v1 }
 0x12f   : > { %1179 = vmatpush3.bf16.msra.mxu1 %v1277_v1 }
 0x130   : > { %1180 = vmatprep.subr.bf16.mxu1 %v1278_v2 }
 0x133   : > { %1181 = vmatpush3.bf16.msra.mxu1 %v1278_v2 }
 0x134   : > { %1182 = vmatprep.subr.bf16.mxu1 %v1279_v3 }
 0x137   : > { %1183 = vmatpush3.bf16.msra.mxu1 %v1279_v3 }
 0x138   : > { %1184 = vmatprep.subr.bf16.mxu1 %v1280_v4 }
 0x13b   : > { %1185 = vmatpush3.bf16.msra.mxu1 %v1280_v4 }
 0x1de   : > { %v1148_v5 = vpop.f32.mrf.mxu1 }
 0x1e0   : > { %v1149_v6 = vpop.f32.mrf.mxu1 }
 0x1e1   : > { %v1150_v8 = vadd.f32 %v1149_v6, %v1148_v5 }
 0x1e2   : > { %v1151_v7 = vpop.f32.mrf.mxu1 }
 0x1e3   : > { %v845_v13 = vadd.f32 %v1150_v8, %v1104_v9 }
 0x1e4   : > { %v1152_v10 = vpop.f32.mrf.mxu1 }
 0x1e5   : > { %v1153_v11 = vadd.f32 %v1152_v10, %v1151_v7 }
 0x1e6   : > { %v1154_v12 = vpop.f32.mrf.mxu1 }
 0x1e7   : > { %v848_v14 = vadd.f32 %v1153_v11, %v1104_v9 }
 0x1e8   : > { %v1155_v15 = vpop.f32.mrf.mxu1 }
 0x1e9   : > { %v859_v16 = vpack.c.bf16 %v848_v14, %v845_v13  ;;  %v1156_v18 = vadd.f32 %v1155_v15, %v1154_v12 }
 0x1ea   : > { %v1157_v17 = vpop.f32.mrf.mxu1 }
 0x1eb   : > { %v861_v19 = vmul.bf16 1009007652, %v859_v16  ;;  %v853_v23 = vadd.f32 %v1156_v18, %v1104_v9 }
 0x1ec   : > { %v1158_v20 = vpop.f32.mrf.mxu1 }
 0x1ed   : > { %v1159_v21 = vadd.f32 %v1158_v20, %v1157_v17  ;;  %v863_v22 = vmax.bf16 %v861_v19, %v859_v16 }
 0x1ef   : > { %v856_v24 = vadd.f32 %v1159_v21, %v1104_v9  ;;  %1186 = vmatprep.mubr.bf16.mxu1 %v863_v22 }
 0x1f1   : > { %v860_v25 = vpack.c.bf16 %v856_v24, %v853_v23 }
 0x1f3   : > { %v862_v26 = vmul.bf16 1009007652, %v860_v25 }
 0x1f5   : > { %v864_v27 = vmax.bf16 %v862_v26, %v860_v25 }
 0x1f7   : > { %1187 = vmatmul.mubr.bf16.vlgmr.msra.gmra.mxu1 %v864_v27 }
 0x2b7   : > { %v1188_v28 = vpop.f32.mrf.mxu1 }
 0x2b8   : > { %v979_v32 = vadd.f32 %v1188_v28, %v1121_v29 }
 0x2b9   : > { %v970_v30 = vpop.f32.mrf.mxu1 }
 0x2ba   : > { %v971_v31 = vadd.f32 %v1121_v29, %v970_v30  ;;  %v987_v39 = vmul.f32 0.01, %v979_v32 }
 0x2bb   : > { %v1189_v33 = vpop.f32.mrf.mxu1 }
 0x2bc   : > { %v985_v34 = vmul.f32 0.01, %v971_v31  ;;  %v982_v35 = vadd.f32 %v1189_v33, %v1121_v29  ;;  %v991_v43 = vmax.f32 %v979_v32, %v987_v39 }
 0x2bd   : > { %v973_v36 = vpop.f32.mrf.mxu1 }
 0x2be   : > { %v989_v37 = vmax.f32 %v971_v31, %v985_v34  ;;  %v974_v38 = vadd.f32 %v1121_v29, %v973_v36  ;;  %v988_v40 = vmul.f32 0.01, %v982_v35  ;;  %996 = vst.msk [vmem:[%s283_s17 + $0x10] sm:$0xff] %vm993_vm2, %v991_v43 }
 0x2c0   : > { %994 = vst.msk [vmem:[%s283_s17] sm:$0xff] %vm993_vm2, %v989_v37  ;;  %v986_v41 = vmul.f32 0.01, %v974_v38  ;;  %v992_v44 = vmax.f32 %v982_v35, %v988_v40 }
 0x2c2   : > { %v990_v42 = vmax.f32 %v974_v38, %v986_v41  ;;  %997 = vst.msk [vmem:[%s283_s17 + $0x18] sm:$0xff] %vm993_vm2, %v992_v44 }
 0x2c4   : > { %995 = vst.msk [vmem:[%s283_s17 + $0x8] sm:$0xff] %vm993_vm2, %v990_v42 }
 0x2c5 PF: > { %s17_s24 = sadd.s32 1, %s1287_s24  }
 0x2c6   : > { %p14_p4 = scmp.ge.s32.totalorder %s17_s24, 4  }
 0x2c8   :  { %16 = sbr.rel (!%p14_p4) target bundleno = 1 (0x1), region = 78 }

</bundles_post_ra>
